<compile_context>
chip_gen: v5e
topology: v5e:2x2
jax: 0.10.0
libtpu: 0.0.40
codegen_flags: <defaults>
</compile_context>

<pallas_src>
import jax
import jax.numpy as jnp
from jax.experimental import pallas as pl
from jax.experimental.pallas import tpu as pltpu

N_OUT = 9          # real number of Q-values
N_OUT_PAD = 128    # lane-dense padded output width (multiple of 128)


def _round_up(x, m):
    return (x + m - 1) // m * m


def dqn_kernel(x_ref, w1_ref, b1_ref, w2_ref, b2_ref, w3_ref, b3_ref, out_ref):
    """Fused 3-layer MLP on one batch tile: relu(x@W1+b1) -> relu(.@W2+b2) -> .@W3p+b3p."""
    x = x_ref[...]                                              # (TILE_B, D_in) f32

    h1 = jnp.dot(x, w1_ref[...], preferred_element_type=jnp.float32)
    h1 = jnp.maximum(h1 + b1_ref[...], 0.0)                     # (TILE_B, 24)

    h2 = jnp.dot(h1, w2_ref[...], preferred_element_type=jnp.float32)
    h2 = jnp.maximum(h2 + b2_ref[...], 0.0)                     # (TILE_B, 32)

    h3 = jnp.dot(h2, w3_ref[...], preferred_element_type=jnp.float32)
    out_ref[...] = h3 + b3_ref[...]                             # (TILE_B, 128) lane-dense


def dqn_forward(x_nchw, params, *, max_tile_b=2048):
    """x_nchw: (B, 3, H, W) float32. Returns (B, 9) float32 Q-values."""
    w1, b1, w2, b2, w3, b3 = params
    B = x_nchw.shape[0]
    # Flatten exactly like torch.flatten(start_dim=1) on NCHW input.
    x = x_nchw.reshape(B, -1).astype(jnp.float32)
    d_in = x.shape[1]

    # Zero-pad the output layer to a lane-dense 128-wide slab.
    # Columns 9..127 are exactly zero, so the wrapper slice is exact.
    w3p = jnp.zeros((w3.shape[0], N_OUT_PAD), jnp.float32).at[:, :N_OUT].set(w3)
    b3p = jnp.zeros((1, N_OUT_PAD), jnp.float32).at[:, :N_OUT].set(b3)

    # Batch tile: multiple of 8 (f32 sublanes), capped so double-buffered
    # x + out tiles stay well inside scoped VMEM on all of v5e/v6e/v7x.
    bytes_per_row = (d_in + N_OUT_PAD) * 4 * 2          # double-buffered in + out
    vmem_budget = 24 * 1024 * 1024
    tile_cap = max(8, min(max_tile_b, (vmem_budget // bytes_per_row) // 8 * 8))
    tile_b = min(tile_cap, _round_up(B, 8))

    b_pad = _round_up(B, tile_b)
    if b_pad != B:
        x = jnp.pad(x, ((0, b_pad - B), (0, 0)))        # harmless zero rows, sliced off below
    num_tiles = b_pad // tile_b

    const_map = lambda i: (0, 0)                        # weights resident across grid steps
    flops = 2 * b_pad * (d_in * 24 + 24 * 32 + 32 * N_OUT_PAD)
    bytes_accessed = 4 * (b_pad * d_in + b_pad * N_OUT_PAD
                          + w1.size + b1.size + w2.size + b2.size
                          + w3p.size + b3p.size)

    out = pl.pallas_call(
        dqn_kernel,
        out_shape=jax.ShapeDtypeStruct((b_pad, N_OUT_PAD), jnp.float32),
        grid=(num_tiles,),
        in_specs=[
            pl.BlockSpec((tile_b, d_in), lambda i: (i, 0)),   # x: tiled along batch
            pl.BlockSpec(w1.shape, const_map),
            pl.BlockSpec(b1.shape, const_map),
            pl.BlockSpec(w2.shape, const_map),
            pl.BlockSpec(b2.shape, const_map),
            pl.BlockSpec(w3p.shape, const_map),
            pl.BlockSpec(b3p.shape, const_map),
        ],
        out_specs=pl.BlockSpec((tile_b, N_OUT_PAD), lambda i: (i, 0)),
        compiler_params=pltpu.CompilerParams(
            dimension_semantics=("parallel",),
            vmem_limit_bytes=48 * 1024 * 1024,
        ),
        cost_estimate=pl.CostEstimate(
            flops=flops, transcendentals=0, bytes_accessed=bytes_accessed),
    )(x, w1, b1, w2, b2, w3p, b3p)

    return out[:B, :N_OUT]


def init_params(key, img_height, img_width):
    """Deterministic init mirroring nn.Linear default (uniform +/- 1/sqrt(fan_in)).
    Weights stored as (in_features, out_features) so the hot path is x @ W + b."""
    d_in = img_height * img_width * 3
    dims = [(d_in, 24), (24, 32), (32, N_OUT)]
    params = []
    for fan_in, fan_out in dims:
        key, kw, kb = jax.random.split(key, 3)
        bound = 1.0 / jnp.sqrt(jnp.float32(fan_in))
        w = jax.random.uniform(kw, (fan_in, fan_out), jnp.float32, -bound, bound)
        b = jax.random.uniform(kb, (1, fan_out), jnp.float32, -bound, bound)
        params += [w, b]
    return tuple(params)


def dqn_reference(x_nchw, params):
    """Pure-JAX reference for validation."""
    w1, b1, w2, b2, w3, b3 = params
    x = x_nchw.reshape(x_nchw.shape[0], -1).astype(jnp.float32)
    h = jnp.maximum(x @ w1 + b1, 0.0)
    h = jnp.maximum(h @ w2 + b2, 0.0)
    return h @ w3 + b3


if __name__ == "__main__":
    key = jax.random.PRNGKey(0)
    img_height, img_width = 16, 16
    batch = 2

    kx, kp = jax.random.split(key)
    x = jax.random.normal(kx, (batch, 3, img_height, img_width), jnp.float32)
    params = init_params(kp, img_height, img_width)

    out = jax.jit(dqn_forward)(x, params)
    out = jax.block_until_ready(out)

    ref = dqn_reference(x, params)
    assert out.shape == (batch, N_OUT)
    assert jnp.allclose(out, ref, atol=1e-4, rtol=1e-4), "mismatch vs reference"

    # Also exercise a ragged, multi-tile batch to validate the grid/padding path.
    kx2 = jax.random.fold_in(kx, 1)
    x_big = jax.random.normal(kx2, (37, 3, img_height, img_width), jnp.float32)
    out_big = jax.block_until_ready(jax.jit(dqn_forward)(x_big, params))
    ref_big = dqn_reference(x_big, params)
    assert out_big.shape == (37, N_OUT)
    assert jnp.allclose(out_big, ref_big, atol=1e-4, rtol=1e-4), "mismatch (ragged batch)"

    print("KERNEL_OK")
</pallas_src>

<mosaic_0001>
module attributes {stable_mosaic.version = 11 : i64} {
  func.func @dqn_kernel(%arg0: i32, %arg1: memref<8x768xf32, #tpu.memory_space<vmem>>, %arg2: memref<768x24xf32, #tpu.memory_space<vmem>>, %arg3: memref<1x24xf32, #tpu.memory_space<vmem>>, %arg4: memref<24x32xf32, #tpu.memory_space<vmem>>, %arg5: memref<1x32xf32, #tpu.memory_space<vmem>>, %arg6: memref<32x128xf32, #tpu.memory_space<vmem>>, %arg7: memref<1x128xf32, #tpu.memory_space<vmem>>, %arg8: memref<8x128xf32, #tpu.memory_space<vmem>>) attributes {dimension_semantics = [#tpu.dimension_semantics<parallel>], iteration_bounds = array<i64: 1>, scalar_prefetch = 0 : i64, scratch_operands = 0 : i64, tpu.core_type = #tpu.core_type<tc>, window_params = [{transform_indices = @transform_0, window_bounds = array<i64: 8, 768>}, {pipeline_mode = #tpu.pipeline_mode<synchronous>, transform_indices = @transform_1, window_bounds = array<i64: 768, 24>}, {pipeline_mode = #tpu.pipeline_mode<synchronous>, transform_indices = @transform_2, window_bounds = array<i64: 1, 24>}, {pipeline_mode = #tpu.pipeline_mode<synchronous>, transform_indices = @transform_3, window_bounds = array<i64: 24, 32>}, {pipeline_mode = #tpu.pipeline_mode<synchronous>, transform_indices = @transform_4, window_bounds = array<i64: 1, 32>}, {pipeline_mode = #tpu.pipeline_mode<synchronous>, transform_indices = @transform_5, window_bounds = array<i64: 32, 128>}, {pipeline_mode = #tpu.pipeline_mode<synchronous>, transform_indices = @transform_6, window_bounds = array<i64: 1, 128>}, {transform_indices = @transform_7, window_bounds = array<i64: 8, 128>}]} {
    %c0 = arith.constant 0 : index
    %c0_0 = arith.constant 0 : index
    %0 = vector.load %arg1[%c0, %c0_0] : memref<8x768xf32, #tpu.memory_space<vmem>>, vector<8x768xf32>
    %c0_1 = arith.constant 0 : index
    %c0_2 = arith.constant 0 : index
    %1 = vector.load %arg2[%c0_1, %c0_2] : memref<768x24xf32, #tpu.memory_space<vmem>>, vector<768x24xf32>
    %cst = arith.constant dense<0.000000e+00> : vector<8x24xf32>
    %2 = tpu.matmul %0, %1, %cst {dimension_numbers = #tpu.dot_dimension_numbers<[1], [0], [0], [1], [0, 0, 1, 1], [], []>} : vector<8x768xf32>, vector<768x24xf32>, vector<8x24xf32> -> vector<8x24xf32>
    %c0_3 = arith.constant 0 : index
    %c0_4 = arith.constant 0 : index
    %3 = vector.load %arg3[%c0_3, %c0_4] : memref<1x24xf32, #tpu.memory_space<vmem>>, vector<1x24xf32>
    %4 = vector.broadcast %3 : vector<1x24xf32> to vector<8x24xf32>
    %5 = arith.addf %2, %4 : vector<8x24xf32>
    %cst_5 = arith.constant 0.000000e+00 : f32
    %6 = vector.broadcast %cst_5 : f32 to vector<8x24xf32>
    %7 = arith.maximumf %5, %6 : vector<8x24xf32>
    %c0_6 = arith.constant 0 : index
    %c0_7 = arith.constant 0 : index
    %8 = vector.load %arg4[%c0_6, %c0_7] : memref<24x32xf32, #tpu.memory_space<vmem>>, vector<24x32xf32>
    %cst_8 = arith.constant dense<0.000000e+00> : vector<8x32xf32>
    %9 = tpu.matmul %7, %8, %cst_8 {dimension_numbers = #tpu.dot_dimension_numbers<[1], [0], [0], [1], [0, 0, 1, 1], [], []>} : vector<8x24xf32>, vector<24x32xf32>, vector<8x32xf32> -> vector<8x32xf32>
    %c0_9 = arith.constant 0 : index
    %c0_10 = arith.constant 0 : index
    %10 = vector.load %arg5[%c0_9, %c0_10] : memref<1x32xf32, #tpu.memory_space<vmem>>, vector<1x32xf32>
    %11 = vector.broadcast %10 : vector<1x32xf32> to vector<8x32xf32>
    %12 = arith.addf %9, %11 : vector<8x32xf32>
    %cst_11 = arith.constant 0.000000e+00 : f32
    %13 = vector.broadcast %cst_11 : f32 to vector<8x32xf32>
    %14 = arith.maximumf %12, %13 : vector<8x32xf32>
    %c0_12 = arith.constant 0 : index
    %c0_13 = arith.constant 0 : index
    %15 = vector.load %arg6[%c0_12, %c0_13] : memref<32x128xf32, #tpu.memory_space<vmem>>, vector<32x128xf32>
    %cst_14 = arith.constant dense<0.000000e+00> : vector<8x128xf32>
    %16 = tpu.matmul %14, %15, %cst_14 {dimension_numbers = #tpu.dot_dimension_numbers<[1], [0], [0], [1], [0, 0, 1, 1], [], []>} : vector<8x32xf32>, vector<32x128xf32>, vector<8x128xf32> -> vector<8x128xf32>
    %c0_15 = arith.constant 0 : index
    %c0_16 = arith.constant 0 : index
    %17 = vector.load %arg7[%c0_15, %c0_16] : memref<1x128xf32, #tpu.memory_space<vmem>>, vector<1x128xf32>
    %18 = vector.broadcast %17 : vector<1x128xf32> to vector<8x128xf32>
    %19 = arith.addf %16, %18 : vector<8x128xf32>
    %c0_17 = arith.constant 0 : index
    %c0_18 = arith.constant 0 : index
    %20 = vector.load %arg8[%c0_17, %c0_18] : memref<8x128xf32, #tpu.memory_space<vmem>>, vector<8x128xf32>
    tpu.vector_store %arg8[%c0_17, %c0_18], %19 {strides = array<i32>} : memref<8x128xf32, #tpu.memory_space<vmem>>, vector<8x128xf32>,
    return
  }
  func.func @transform_0(%arg0: i32) -> (i32, i32) {
    %c0_i32 = arith.constant 0 : i32
    %c0_i32_0 = arith.constant 0 : i32
    return %arg0, %c0_i32 : i32, i32
  }
  func.func @transform_1(%arg0: i32) -> (i32, i32) {
    %c0_i32 = arith.constant 0 : i32
    %c0_i32_0 = arith.constant 0 : i32
    %c0_i32_1 = arith.constant 0 : i32
    return %c0_i32, %c0_i32_0 : i32, i32
  }
  func.func @transform_2(%arg0: i32) -> (i32, i32) {
    %c0_i32 = arith.constant 0 : i32
    %c0_i32_0 = arith.constant 0 : i32
    %c0_i32_1 = arith.constant 0 : i32
    return %c0_i32, %c0_i32_0 : i32, i32
  }
  func.func @transform_3(%arg0: i32) -> (i32, i32) {
    %c0_i32 = arith.constant 0 : i32
    %c0_i32_0 = arith.constant 0 : i32
    %c0_i32_1 = arith.constant 0 : i32
    return %c0_i32, %c0_i32_0 : i32, i32
  }
  func.func @transform_4(%arg0: i32) -> (i32, i32) {
    %c0_i32 = arith.constant 0 : i32
    %c0_i32_0 = arith.constant 0 : i32
    %c0_i32_1 = arith.constant 0 : i32
    return %c0_i32, %c0_i32_0 : i32, i32
  }
  func.func @transform_5(%arg0: i32) -> (i32, i32) {
    %c0_i32 = arith.constant 0 : i32
    %c0_i32_0 = arith.constant 0 : i32
    %c0_i32_1 = arith.constant 0 : i32
    return %c0_i32, %c0_i32_0 : i32, i32
  }
  func.func @transform_6(%arg0: i32) -> (i32, i32) {
    %c0_i32 = arith.constant 0 : i32
    %c0_i32_0 = arith.constant 0 : i32
    %c0_i32_1 = arith.constant 0 : i32
    return %c0_i32, %c0_i32_0 : i32, i32
  }
  func.func @transform_7(%arg0: i32) -> (i32, i32) {
    %c0_i32 = arith.constant 0 : i32
    %c0_i32_0 = arith.constant 0 : i32
    return %arg0, %c0_i32 : i32, i32
  }
}

</mosaic_0001>

<bundles_post_ra>
// kernel: dqn_forward.1
= control target key start
LH: loop header
LB: loop body
LE: loop exit
PB: predicated region body
PF: predicated region fallthrough
CT: control target
= control target key end

     0   :  { %vm260_vm0 = vcmask 195584   ;;  %vm293_vm1 = vcmask 261120   ;;  %s706_s1 = inlined_call_operand.vmem [shape: f32[768,24], index: 1, kind: input, shape index: {}]   ;;  %s707_s2 = inlined_call_operand.vmem [shape: f32[1,24], index: 2, kind: input, shape index: {}]   ;;  %s708_s0 = inlined_call_operand.vmem [shape: f32[8,768], index: 0, kind: input, shape index: {}]   ;;  %s709_s4 = inlined_call_operand.vmem [shape: f32[1,32], index: 4, kind: input, shape index: {}]   ;;  %s710_s3 = inlined_call_operand.vmem [shape: f32[24,32], index: 3, kind: input, shape index: {}]   ;;  %s711_s5 = inlined_call_operand.vmem [shape: f32[32,128], index: 5, kind: input, shape index: {}]   ;;  %s712_s6 = inlined_call_operand.vmem [shape: f32[1,128], index: 6, kind: input, shape index: {}]   ;;  %s713_s7 = inlined_call_operand.vmem [shape: f32[8,128], index: 7, kind: output, shape index: {}]  }
   0x1   :  { %v47_v0 = vld [vmem:[%s706_s1 + $0x78] sm:$0xff]  ;;  %v46_v1 = vld [vmem:[%s706_s1 + $0x70] sm:$0xff]  ;;  %v45_v4 = vld [vmem:[%s706_s1 + $0x68] sm:$0xff] }
   0x2   :  { %v63_v2 = vld [vmem:[%s706_s1 + $0xf8] sm:$0xff]  ;;  %132 = vmatpush.msra.mxu0 %v47_v0  ;;  %v62_v3 = vld [vmem:[%s706_s1 + $0xf0] sm:$0xff]  ;;  %v61_v5 = vld [vmem:[%s706_s1 + $0xe8] sm:$0xff] }
   0x3   :  { %152 = vmatpush.msra.mxu1 %v63_v2  ;;  %v44_v6 = vld [vmem:[%s706_s1 + $0x60] sm:$0xff]  ;;  %v43_v8 = vld [vmem:[%s706_s1 + $0x58] sm:$0xff]  ;;  %v42_v10 = vld [vmem:[%s706_s1 + $0x50] sm:$0xff] }
   0x4   :  { %133 = vmatpush.msra.mxu0 %v46_v1  ;;  %v60_v7 = vld [vmem:[%s706_s1 + $0xe0] sm:$0xff]  ;;  %v59_v9 = vld [vmem:[%s706_s1 + $0xd8] sm:$0xff]  ;;  %v58_v12 = vld [vmem:[%s706_s1 + $0xd0] sm:$0xff] }
   0x5   :  { %153 = vmatpush.msra.mxu1 %v62_v3  ;;  %v79_v11 = vld [vmem:[%s706_s1 + $0x178] sm:$0xff]  ;;  %v78_v13 = vld [vmem:[%s706_s1 + $0x170] sm:$0xff]  ;;  %v77_v15 = vld [vmem:[%s706_s1 + $0x168] sm:$0xff] }
   0x6   :  { %134 = vmatpush.msra.mxu0 %v45_v4  ;;  %172 = vmatpush.msra.mxu2 %v79_v11  ;;  %v95_v14 = vld [vmem:[%s706_s1 + $0x1f8] sm:$0xff]  ;;  %v94_v16 = vld [vmem:[%s706_s1 + $0x1f0] sm:$0xff]  ;;  %v41_v17 = vld [vmem:[%s706_s1 + $0x48] sm:$0xff] }
   0x7   :  { %154 = vmatpush.msra.mxu1 %v61_v5  ;;  %v57_v18 = vld [vmem:[%s706_s1 + $0xc8] sm:$0xff]  ;;  %192 = vmatpush.msra.mxu3 %v95_v14  ;;  %v76_v19 = vld [vmem:[%s706_s1 + $0x160] sm:$0xff]  ;;  %v75_v23 = vld [vmem:[%s706_s1 + $0x158] sm:$0xff] }
   0x8   :  { %135 = vmatpush.msra.mxu0 %v44_v6  ;;  %173 = vmatpush.msra.mxu2 %v78_v13  ;;  %v93_v20 = vld [vmem:[%s706_s1 + $0x1e8] sm:$0xff]  ;;  %v40_v21 = vld [vmem:[%s706_s1 + $0x40] sm:$0xff]  ;;  %v39_v25 = vld [vmem:[%s706_s1 + $0x38] sm:$0xff] }
   0x9   :  { %155 = vmatpush.msra.mxu1 %v60_v7  ;;  %v56_v22 = vld [vmem:[%s706_s1 + $0xc0] sm:$0xff]  ;;  %193 = vmatpush.msra.mxu3 %v94_v16  ;;  %v55_v26 = vld [vmem:[%s706_s1 + $0xb8] sm:$0xff]  ;;  %v74_v27 = vld [vmem:[%s706_s1 + $0x150] sm:$0xff] }
   0xa   :  { %136 = vmatpush.msra.mxu0 %v43_v8  ;;  %174 = vmatpush.msra.mxu2 %v77_v15  ;;  %v92_v24 = vld [vmem:[%s706_s1 + $0x1e0] sm:$0xff]  ;;  %v91_v28 = vld [vmem:[%s706_s1 + $0x1d8] sm:$0xff]  ;;  %v38_v29 = vld [vmem:[%s706_s1 + $0x30] sm:$0xff] }
   0xb   :  { %156 = vmatpush.msra.mxu1 %v59_v9  ;;  %194 = vmatpush.msra.mxu3 %v93_v20  ;;  %v54_v30 = vld [vmem:[%s706_s1 + $0xb0] sm:$0xff]  ;;  %v73_v31 = vld [vmem:[%s706_s1 + $0x148] sm:$0xff]  ;;  %v72_v35 = vld [vmem:[%s706_s1 + $0x140] sm:$0xff] }
   0xc   :  { %137 = vmatpush.msra.mxu0 %v42_v10  ;;  %175 = vmatpush.msra.mxu2 %v76_v19  ;;  %v90_v32 = vld [vmem:[%s706_s1 + $0x1d0] sm:$0xff]  ;;  %v37_v33 = vld [vmem:[%s706_s1 + $0x28] sm:$0xff]  ;;  %v36_v37 = vld [vmem:[%s706_s1 + $0x20] sm:$0xff] }
   0xd   :  { %157 = vmatpush.msra.mxu1 %v58_v12  ;;  %195 = vmatpush.msra.mxu3 %v92_v24  ;;  %v53_v34 = vld [vmem:[%s706_s1 + $0xa8] sm:$0xff]  ;;  %v52_v38 = vld [vmem:[%s706_s1 + $0xa0] sm:$0xff]  ;;  %v71_v39 = vld [vmem:[%s706_s1 + $0x138] sm:$0xff] }
   0xe   :  { %138 = vmatpush.msra.mxu0 %v41_v17  ;;  %176 = vmatpush.msra.mxu2 %v75_v23  ;;  %v89_v36 = vld [vmem:[%s706_s1 + $0x1c8] sm:$0xff]  ;;  %v88_v40 = vld [vmem:[%s706_s1 + $0x1c0] sm:$0xff]  ;;  %v35_v41 = vld [vmem:[%s706_s1 + $0x18] sm:$0xff] }
   0xf   :  { %158 = vmatpush.msra.mxu1 %v57_v18  ;;  %196 = vmatpush.msra.mxu3 %v91_v28  ;;  %v51_v42 = vld [vmem:[%s706_s1 + $0x98] sm:$0xff]  ;;  %v70_v43 = vld [vmem:[%s706_s1 + $0x130] sm:$0xff]  ;;  %v69_v47 = vld [vmem:[%s706_s1 + $0x128] sm:$0xff] }
  0x10   :  { %139 = vmatpush.msra.mxu0 %v40_v21  ;;  %177 = vmatpush.msra.mxu2 %v74_v27  ;;  %v87_v44 = vld [vmem:[%s706_s1 + $0x1b8] sm:$0xff]  ;;  %v34_v45 = vld [vmem:[%s706_s1 + $0x10] sm:$0xff]  ;;  %v33_v49 = vld [vmem:[%s706_s1 + $0x8] sm:$0xff] }
  0x11   :  { %159 = vmatpush.msra.mxu1 %v56_v22  ;;  %197 = vmatpush.msra.mxu3 %v90_v32  ;;  %v50_v46 = vld [vmem:[%s706_s1 + $0x90] sm:$0xff]  ;;  %v49_v50 = vld [vmem:[%s706_s1 + $0x88] sm:$0xff]  ;;  %v68_v51 = vld [vmem:[%s706_s1 + $0x120] sm:$0xff] }
  0x12   :  { %140 = vmatpush.msra.mxu0 %v39_v25  ;;  %178 = vmatpush.msra.mxu2 %v73_v31  ;;  %v86_v48 = vld [vmem:[%s706_s1 + $0x1b0] sm:$0xff]  ;;  %v85_v52 = vld [vmem:[%s706_s1 + $0x1a8] sm:$0xff]  ;;  %v32_v53 = vld [vmem:[%s706_s1] sm:$0xff] }
  0x13   :  { %160 = vmatpush.msra.mxu1 %v55_v26  ;;  %198 = vmatpush.msra.mxu3 %v89_v36  ;;  %v48_v54 = vld [vmem:[%s706_s1 + $0x80] sm:$0xff]  ;;  %v111_v55 = vld [vmem:[%s706_s1 + $0x278] sm:$0xff]  ;;  %v110_v59 = vld [vmem:[%s706_s1 + $0x270] sm:$0xff] }
  0x14   :  { %141 = vmatpush.msra.mxu0 %v38_v29  ;;  %179 = vmatpush.msra.mxu2 %v72_v35  ;;  %v127_v56 = vld [vmem:[%s706_s1 + $0x2f8] sm:$0xff]  ;;  %v84_v58 = vld [vmem:[%s706_s1 + $0x1a0] sm:$0xff]  ;;  %v126_v60 = vld [vmem:[%s706_s1 + $0x2f0] sm:$0xff] }
  0x15   :  { %161 = vmatpush.msra.mxu1 %v54_v30  ;;  %199 = vmatpush.msra.mxu3 %v88_v40  ;;  %v67_v57 = vld [vmem:[%s706_s1 + $0x118] sm:$0xff]  ;;  %v66_v61 = vld [vmem:[%s706_s1 + $0x110] sm:$0xff]  ;;  %v109_v63 = vld [vmem:[%s706_s1 + $0x268] sm:$0xff] }
  0x16   :  { %142 = vmatpush.msra.mxu0 %v37_v33  ;;  %180 = vmatpush.msra.mxu2 %v71_v39  ;;  %v83_v62 = vld [vmem:[%s706_s1 + $0x198] sm:$0xff]  ;;  %v125_v0 = vld [vmem:[%s706_s1 + $0x2e8] sm:$0xff]  ;;  %v82_v2 = vld [vmem:[%s706_s1 + $0x190] sm:$0xff] }
  0x17   :  { %162 = vmatpush.msra.mxu1 %v53_v34  ;;  %200 = vmatpush.msra.mxu3 %v87_v44  ;;  %v65_v1 = vld [vmem:[%s706_s1 + $0x108] sm:$0xff]  ;;  %v108_v3 = vld [vmem:[%s706_s1 + $0x260] sm:$0xff]  ;;  %v107_v7 = vld [vmem:[%s706_s1 + $0x258] sm:$0xff] }
  0x18   :  { %143 = vmatpush.msra.mxu0 %v36_v37  ;;  %181 = vmatpush.msra.mxu2 %v70_v43  ;;  %v124_v4 = vld [vmem:[%s706_s1 + $0x2e0] sm:$0xff]  ;;  %v81_v6 = vld [vmem:[%s706_s1 + $0x188] sm:$0xff]  ;;  %v123_v8 = vld [vmem:[%s706_s1 + $0x2d8] sm:$0xff] }
  0x19   :  { %163 = vmatpush.msra.mxu1 %v52_v38  ;;  %201 = vmatpush.msra.mxu3 %v86_v48  ;;  %v64_v5 = vld [vmem:[%s706_s1 + $0x100] sm:$0xff]  ;;  %v28_v9 = vld [vmem:[%s708_s0 + $0x10] sm:$0xff]  ;;  %v29_v14 = vld [vmem:[%s708_s0 + $0x18] sm:$0xff] }
  0x1a   :  { %144 = vmatpush.msra.mxu0 %v35_v41  ;;  %182 = vmatpush.msra.mxu2 %v69_v47  ;;  %v80_v10 = vld [vmem:[%s706_s1 + $0x180] sm:$0xff]  ;;  %v106_v11 = vld [vmem:[%s706_s1 + $0x250] sm:$0xff]  ;;  %v105_v15 = vld [vmem:[%s706_s1 + $0x248] sm:$0xff] }
  0x1b   :  { %164 = vmatpush.msra.mxu1 %v51_v42  ;;  %202 = vmatpush.msra.mxu3 %v85_v52  ;;  %v122_v12 = vld [vmem:[%s706_s1 + $0x2d0] sm:$0xff]  ;;  %v26_v13 = vld [vmem:[%s708_s0] sm:$0xff]  ;;  %v121_v16 = vld [vmem:[%s706_s1 + $0x2c8] sm:$0xff] }
  0x1c   :  { %145 = vmatpush.msra.mxu0 %v34_v45  ;;  %183 = vmatpush.msra.mxu2 %v68_v51  ;;  %v27_v17 = vld [vmem:[%s708_s0 + $0x8] sm:$0xff]  ;;  %v104_v18 = vld [vmem:[%s706_s1 + $0x240] sm:$0xff]  ;;  %v103_v20 = vld [vmem:[%s706_s1 + $0x238] sm:$0xff] }
  0x1d   :  { %165 = vmatpush.msra.mxu1 %v50_v46  ;;  %203 = vmatpush.msra.mxu3 %v84_v58  ;;  %v120_v19 = vld [vmem:[%s706_s1 + $0x2c0] sm:$0xff]  ;;  %v119_v21 = vld [vmem:[%s706_s1 + $0x2b8] sm:$0xff]  ;;  %v102_v22 = vld [vmem:[%s706_s1 + $0x230] sm:$0xff] }
  0x1e   :  { %146 = vmatpush.msra.mxu0 %v33_v49  ;;  %184 = vmatpush.msra.mxu2 %v67_v57  ;;  %v118_v23 = vld [vmem:[%s706_s1 + $0x2b0] sm:$0xff]  ;;  %v101_v24 = vld [vmem:[%s706_s1 + $0x228] sm:$0xff]  ;;  %v100_v26 = vld [vmem:[%s706_s1 + $0x220] sm:$0xff] }
  0x1f   :  { %166 = vmatpush.msra.mxu1 %v49_v50  ;;  %204 = vmatpush.msra.mxu3 %v83_v62  ;;  %v117_v25 = vld [vmem:[%s706_s1 + $0x2a8] sm:$0xff]  ;;  %v116_v27 = vld [vmem:[%s706_s1 + $0x2a0] sm:$0xff]  ;;  %v99_v28 = vld [vmem:[%s706_s1 + $0x218] sm:$0xff] }
  0x20   :  { %147 = vmatpush.msra.mxu0 %v32_v53  ;;  %185 = vmatpush.msra.mxu2 %v66_v61  ;;  %v115_v29 = vld [vmem:[%s706_s1 + $0x298] sm:$0xff]  ;;  %v98_v30 = vld [vmem:[%s706_s1 + $0x210] sm:$0xff]  ;;  %v97_v32 = vld [vmem:[%s706_s1 + $0x208] sm:$0xff] }
  0x21   :  { %167 = vmatpush.msra.mxu1 %v48_v54  ;;  %205 = vmatpush.msra.mxu3 %v82_v2  ;;  %v114_v31 = vld [vmem:[%s706_s1 + $0x290] sm:$0xff]  ;;  %v113_v33 = vld [vmem:[%s706_s1 + $0x288] sm:$0xff]  ;;  %v96_v34 = vld [vmem:[%s706_s1 + $0x200] sm:$0xff] }
  0x22   :  { %212 = vmatpush.msrb.mxu0 %v111_v55  ;;  %186 = vmatpush.msra.mxu2 %v65_v1  ;;  %v112_v35 = vld [vmem:[%s706_s1 + $0x280] sm:$0xff]  ;;  %v31_v37 = vld [vmem:[%s708_s0 + $0x28] sm:$0xff]  ;;  %v255_v38 = vld [vmem:[%s710_s3 + $0x10] sm:$0xff] }
  0x23   :  { %232 = vmatpush.msrb.mxu1 %v127_v56  ;;  %206 = vmatpush.msra.mxu3 %v81_v6  ;;  %v30_v36 = vld [vmem:[%s708_s0 + $0x20] sm:$0xff]  ;;  %v254_v39 = vld [vmem:[%s710_s3 + $0x8] sm:$0xff]  ;;  %v288_v41 = vld [vmem:[%s711_s5 + $0x18] sm:$0xff] }
  0x24   :  { %213 = vmatpush.msrb.mxu0 %v110_v59  ;;  %187 = vmatpush.msra.mxu2 %v64_v5  ;;  %v253_v40 = vld [vmem:[%s710_s3] sm:$0xff]  ;;  %v287_v42 = vld [vmem:[%s711_s5 + $0x10] sm:$0xff]  ;;  %v286_v57 = vld [vmem:[%s711_s5 + $0x8] sm:$0xff] }
  0x25   :  { %233 = vmatpush.msrb.mxu1 %v126_v60  ;;  %188 = vmatmul.f32.vlgmr.msra.gmra.mxu2 %v28_v9  ;;  %v324_v43 = vld [vmem:[%s707_s2] ss:$0 sm:$0xff] }
  0x26   :  { %214 = vmatpush.msrb.mxu0 %v109_v63  ;;  %207 = vmatpush.msra.mxu3 %v80_v10  ;;  %v285_v58 = vld [vmem:[%s711_s5] sm:$0xff] }
  0x27   :  { %234 = vmatpush.msrb.mxu1 %v125_v0  ;;  %148 = vmatmul.f32.vlgmr.msra.gmra.mxu0 %v26_v13  ;;  %v325_v59 = vld [vmem:[%s709_s4] ss:$0 sm:$0xff] }
  0x28   :  { %215 = vmatpush.msrb.mxu0 %v108_v3  ;;  %208 = vmatmul.f32.vlgmr.msra.gmra.mxu3 %v29_v14  ;;  %v326_v63 = vld [vmem:[%s712_s6] ss:$0 sm:$0xff] }
  0x29   :  { %235 = vmatpush.msrb.mxu1 %v124_v4  ;;  %277 = vmatpush.msrb.mxu2 %v255_v38 }
  0x2a   :  { %216 = vmatpush.msrb.mxu0 %v107_v7  ;;  %168 = vmatmul.f32.vlgmr.msra.gmra.mxu1 %v27_v17 }
  0x2b   :  { %236 = vmatpush.msrb.mxu1 %v123_v8  ;;  %278 = vmatpush.msrb.mxu2 %v254_v39 }
  0x2c   :  { %217 = vmatpush.msrb.mxu0 %v106_v11  ;;  %309 = vmatpush.msrb.mxu3 %v288_v41 }
  0x2d   :  { %237 = vmatpush.msrb.mxu1 %v122_v12  ;;  %279 = vmatpush.msrb.mxu2 %v253_v40 }
  0x2e   :  { %218 = vmatpush.msrb.mxu0 %v105_v15  ;;  %310 = vmatpush.msrb.mxu3 %v287_v42 }
  0x2f   :  { %238 = vmatpush.msrb.mxu1 %v121_v16 }
  0x30   :  { %219 = vmatpush.msrb.mxu0 %v104_v18  ;;  %311 = vmatpush.msrb.mxu3 %v286_v57 }
  0x31   :  { %239 = vmatpush.msrb.mxu1 %v120_v19 }
  0x32   :  { %220 = vmatpush.msrb.mxu0 %v103_v20  ;;  %312 = vmatpush.msrb.mxu3 %v285_v58 }
  0x33   :  { %240 = vmatpush.msrb.mxu1 %v119_v21 }
  0x34   :  { %221 = vmatpush.msrb.mxu0 %v102_v22 }
  0x35   :  { %241 = vmatpush.msrb.mxu1 %v118_v23 }
  0x36   :  { %222 = vmatpush.msrb.mxu0 %v101_v24 }
  0x37   :  { %242 = vmatpush.msrb.mxu1 %v117_v25 }
  0x38   :  { %223 = vmatpush.msrb.mxu0 %v100_v26 }
  0x39   :  { %243 = vmatpush.msrb.mxu1 %v116_v27 }
  0x3a   :  { %224 = vmatpush.msrb.mxu0 %v99_v28 }
  0x3b   :  { %244 = vmatpush.msrb.mxu1 %v115_v29 }
  0x3c   :  { %225 = vmatpush.msrb.mxu0 %v98_v30 }
  0x3d   :  { %245 = vmatpush.msrb.mxu1 %v114_v31 }
  0x3e   :  { %226 = vmatpush.msrb.mxu0 %v97_v32 }
  0x3f   :  { %246 = vmatpush.msrb.mxu1 %v113_v33 }
  0x40   :  { %227 = vmatpush.msrb.mxu0 %v96_v34 }
  0x41   :  { %247 = vmatpush.msrb.mxu1 %v112_v35  ;;  %228 = vmatmul.f32.vlgmr.msrb.gmra.mxu0 %v30_v36 }
  0x42   :  { %248 = vmatmul.f32.vlgmr.msrb.gmra.mxu1 %v31_v37 }
  0xa4   :  { %v149_v44 = vpop.f32.mrf.mxu0 }
  0xa5   :  { %v150_v45 = vadd.f32 %v324_v43, %v149_v44 }
  0xa7   :  { %v169_v46 = vpop.f32.mrf.mxu1 }
  0xa8   :  { %v170_v47 = vadd.f32 %v169_v46, %v150_v45  ;;  %v189_v48 = vpop.f32.mrf.mxu2 }
  0xaa   :  { %v190_v49 = vadd.f32 %v189_v48, %v170_v47 }
  0xab   :  { %v209_v50 = vpop.f32.mrf.mxu3 }
  0xac   :  { %v210_v51 = vadd.f32 %v209_v50, %v190_v49 }
  0xbe   :  { %v229_v52 = vpop.f32.mrf.mxu0 }
  0xbf   :  { %v249_v53 = vpop.f32.mrf.mxu1  ;;  %v230_v54 = vadd.f32 %v229_v52, %v210_v51 }
  0xc1   :  { %v250_v55 = vadd.f32 %v249_v53, %v230_v54 }
  0xc3   :  { %v252_v56 = vmax.f32 %v250_v55, 0.0 }
  0xc5   :  { %322 = vmatmul.msk.f32.vlgmr.msrb.gmra.mxu2 %vm260_vm0, %v252_v56 }
 0x148   :  { %v281_v60 = vpop.f32.mrf.mxu2 }
 0x149   :  { %v282_v61 = vadd.f32 %v325_v59, %v281_v60 }
 0x14b   :  { %v284_v62 = vmax.f32 %v282_v61, 0.0 }
 0x14d   :  { %323 = vmatmul.msk.f32.vlgmr.msrb.gmra.mxu3 %vm293_vm1, %v284_v62 }
 0x1d0   :  { %v314_v0 = vpop.f32.mrf.mxu3 }
 0x1d1   :  { %v315_v1 = vadd.f32 %v326_v63, %v314_v0 }
 0x1d3   :  { %317 = vst [vmem:[%s713_s7] sm:$0xff] %v315_v1 }

</bundles_post_ra>
